<compile_context>
chip_gen: v7x
topology: tpu7x:2x2x1
jax: 0.10.0
libtpu: 0.0.40
codegen_flags: <defaults>
</compile_context>

<pallas_src>
import functools

import jax
import jax.numpy as jnp
from jax.experimental import pallas as pl
from jax.experimental.pallas import tpu as pltpu


def _round_up(a, b):
    return (a + b - 1) // b * b


def _choose_tiling(N, C, HW, itemsize, target_tile_bytes, nb_cap=8):
    """Pick (images-per-step nb, lanes-per-step tile_hw).

    Sizing rule is bytes per x tile (~target_tile_bytes), not lane count.
    """
    bytes_per_lane = C * itemsize
    hw128 = _round_up(HW, 128)
    tile_hw = max(128, (target_tile_bytes // bytes_per_lane) // 128 * 128)
    tile_hw = min(tile_hw, hw128)
    nb = 1
    if tile_hw >= hw128:
        # Whole image fits in one lane tile: fold several images per grid step
        # so small feature maps still move >= ~target bytes per step.
        tile_hw = hw128
        per_img = hw128 * bytes_per_lane
        nb = int(max(1, min(nb_cap, N, target_tile_bytes // max(per_img, 1))))
        while N % nb:          # keep the batch block an exact divisor of N
            nb -= 1
    # v7x has 2 TensorCores: keep >= 2 grid steps when possible so both get work.
    steps = (-(-N // nb)) * (-(-HW // tile_hw))
    if steps < 2:
        if nb > 1:
            nb = max(1, (N + 1) // 2)
            while N % nb:
                nb -= 1
        elif tile_hw > 128:
            tile_hw = _round_up(-(-tile_hw // 2), 128)
    return nb, tile_hw


def _pa_attention_kernel(*refs, nb, fuse_ca, fuse_skip):
    # refs layout: x, [ca], [skip], w1, b1, w2, b2, out
    i = 0
    x_ref = refs[i]; i += 1
    ca_ref = refs[i] if fuse_ca else None
    i += int(fuse_ca)
    skip_ref = refs[i] if fuse_skip else None
    i += int(fuse_skip)
    w1_ref, b1_ref, w2_ref, b2_ref = refs[i:i + 4]
    o_ref = refs[i + 4]

    w1 = w1_ref[...]          # (Cm, C) in activation dtype (bf16 MXU on v6e/v7x)
    b1 = b1_ref[...]          # (Cm, 1) f32
    w2 = w2_ref[...]          # (Cm, 1) f32: conv2 weight as a column
    b2 = b2_ref[0, 0]         # scalar  f32 (SMEM)

    # Short static loop over the images folded into this block; compute is
    # negligible next to HBM traffic, so a small unrolled loop is fine.
    # NOTE: on the lane-edge block the lanes beyond HW hold uninitialised VMEM
    # data; all math below is lane-local and the out-of-bounds stores are
    # masked, so this is harmless — do NOT "fix" it by padding in the wrapper.
    for n in range(nb):
        x = x_ref[n]                                            # (C, T), no f32 upcast
        if fuse_ca:
            x = x * ca_ref[n].astype(x.dtype)                   # CALayer scale (C, 1)
        # conv1 (1x1, C -> C//8): MXU matmul, f32 accumulate.
        h = jnp.dot(w1, x, preferred_element_type=jnp.float32)  # (Cm, T)
        h = jnp.maximum(h + b1, 0.0)                            # ReLU
        # conv2 (C//8 -> 1): VPU multiply + sublane reduce (no 1-wide MXU result).
        y = jnp.sum(h * w2, axis=0, keepdims=True) + b2         # (1, T) f32
        y = jax.nn.sigmoid(y)                                   # EUP
        out = x * y.astype(x.dtype)                             # PALayer gate
        if fuse_skip:
            out = out + skip_ref[n]                             # residual add
        o_ref[n] = out.astype(o_ref.dtype)


def _attention_pallas(x_nchw, w1, b1, w2, b2, ca_scale=None, skip=None,
                      *, target_tile_bytes=2 << 20):
    """out = (x*ca) * sigmoid(conv2(relu(conv1(x*ca)))) [+ skip] (1x1 convs)."""
    N, C, H, W = x_nchw.shape
    Cm = w1.shape[0]          # C // 8
    HW = H * W
    dt = x_nchw.dtype
    nb, tile_hw = _choose_tiling(N, C, HW, jnp.dtype(dt).itemsize,
                                 target_tile_bytes)

    # NCHW-native flatten: pure reshape; no pad / slice HBM round trips.
    x_flat = x_nchw.reshape(N, C, HW)

    fuse_ca = ca_scale is not None
    fuse_skip = skip is not None

    data_spec = pl.BlockSpec((nb, C, tile_hw), lambda n, j: (n, 0, j))
    inputs = [x_flat]
    in_specs = [data_spec]
    if fuse_ca:
        inputs.append(ca_scale.reshape(N, C, 1).astype(jnp.float32))
        in_specs.append(pl.BlockSpec((nb, C, 1), lambda n, j: (n, 0, 0)))
    if fuse_skip:
        inputs.append(skip.reshape(N, C, HW).astype(dt))
        in_specs.append(data_spec)
    inputs += [
        w1.astype(dt),                                  # (Cm, C) activation dtype
        b1.reshape(Cm, 1).astype(jnp.float32),          # (Cm, 1)
        jnp.transpose(w2).astype(jnp.float32),          # (Cm, 1) conv2 weight column
        b2.reshape(1, 1).astype(jnp.float32),           # SMEM scalar
    ]
    in_specs += [
        pl.BlockSpec((Cm, C), lambda n, j: (0, 0)),
        pl.BlockSpec((Cm, 1), lambda n, j: (0, 0)),
        pl.BlockSpec((Cm, 1), lambda n, j: (0, 0)),
        pl.BlockSpec(memory_space=pltpu.MemorySpace.SMEM),
    ]

    grid = (pl.cdiv(N, nb), pl.cdiv(HW, tile_hw))
    out_flat = pl.pallas_call(
        functools.partial(_pa_attention_kernel, nb=nb,
                          fuse_ca=fuse_ca, fuse_skip=fuse_skip),
        out_shape=jax.ShapeDtypeStruct((N, C, HW), dt),
        grid_spec=pltpu.PrefetchScalarGridSpec(
            num_scalar_prefetch=0,
            grid=grid,
            in_specs=in_specs,
            out_specs=data_spec,
        ),
        compiler_params=pltpu.CompilerParams(
            dimension_semantics=("parallel", "parallel"),
            vmem_limit_bytes=32 * 1024 * 1024,
        ),
    )(*inputs)
    return out_flat.reshape(N, C, H, W)


@functools.partial(jax.jit, static_argnames=("target_tile_bytes",))
def palayer_forward(x, w1, b1, w2, b2, *, target_tile_bytes=2 << 20):
    """PALayer.forward: x * sigmoid(conv2(relu(conv1(x)))) with 1x1 convs."""
    return _attention_pallas(x, w1, b1, w2, b2,
                             target_tile_bytes=target_tile_bytes)


def _calayer_scale(x, wc1, bc1, wc2, bc2):
    # TODO(synk): CALayer's global average pool and its two 1x1 convs act on an
    # (N, C, 1, 1) tensor — tiny, so they stay in XLA; only the elementwise
    # application x * scale is fused into the Pallas kernel.
    p = jnp.mean(x.astype(jnp.float32), axis=(2, 3))                 # (N, C)
    h = jnp.maximum(p @ wc1.T + bc1[None, :], 0.0)                   # (N, C//8)
    return jax.nn.sigmoid(h @ wc2.T + bc2[None, :])                  # (N, C)


@functools.partial(jax.jit, static_argnames=("target_tile_bytes",))
def dehazeblock_tail_forward(res, skip, ca_w1, ca_b1, ca_w2, ca_b2,
                             pa_w1, pa_b1, pa_w2, pa_b2,
                             *, target_tile_bytes=2 << 20):
    """DehazeBlock tail: PALayer(CALayer(res)) + skip, elementwise work fused."""
    scale = _calayer_scale(res, ca_w1, ca_b1, ca_w2, ca_b2)
    return _attention_pallas(res, pa_w1, pa_b1, pa_w2, pa_b2,
                             ca_scale=scale, skip=skip,
                             target_tile_bytes=target_tile_bytes)


# ----------------------------- pure-JAX references -----------------------------

def _conv1x1(x, w, b):
    return jnp.einsum("nchw,oc->nohw", x, w) + b[None, :, None, None]


def _palayer_reference(x, w1, b1, w2, b2):
    h = jnp.maximum(_conv1x1(x, w1, b1), 0.0)
    y = jax.nn.sigmoid(_conv1x1(h, w2, b2))
    return x * y


def _dehazeblock_tail_reference(res, skip, ca_w1, ca_b1, ca_w2, ca_b2,
                                pa_w1, pa_b1, pa_w2, pa_b2):
    s = _calayer_scale(res, ca_w1, ca_b1, ca_w2, ca_b2)[:, :, None, None]
    r = res * s
    return _palayer_reference(r, pa_w1, pa_b1, pa_w2, pa_b2) + skip


if __name__ == "__main__":
    key = jax.random.PRNGKey(0)
    N, C, H, W = 2, 32, 16, 16          # channel count must be divisible by 8
    Cm = C // 8

    ks = jax.random.split(key, 10)
    x = jax.random.normal(ks[0], (N, C, H, W), dtype=jnp.float32)
    pa_w1 = 0.1 * jax.random.normal(ks[1], (Cm, C), dtype=jnp.float32)   # conv1 (out,in)
    pa_b1 = 0.1 * jax.random.normal(ks[2], (Cm,), dtype=jnp.float32)
    pa_w2 = 0.1 * jax.random.normal(ks[3], (1, Cm), dtype=jnp.float32)   # conv2 (out,in)
    pa_b2 = 0.1 * jax.random.normal(ks[4], (1,), dtype=jnp.float32)
    ca_w1 = 0.1 * jax.random.normal(ks[5], (Cm, C), dtype=jnp.float32)
    ca_b1 = 0.1 * jax.random.normal(ks[6], (Cm,), dtype=jnp.float32)
    ca_w2 = 0.1 * jax.random.normal(ks[7], (C, Cm), dtype=jnp.float32)
    ca_b2 = 0.1 * jax.random.normal(ks[8], (C,), dtype=jnp.float32)
    skip = jax.random.normal(ks[9], (N, C, H, W), dtype=jnp.float32)

    # 1) Standalone PALayer, f32.
    out = jax.block_until_ready(palayer_forward(x, pa_w1, pa_b1, pa_w2, pa_b2))
    ref = _palayer_reference(x, pa_w1, pa_b1, pa_w2, pa_b2)
    assert out.shape == x.shape
    assert jnp.allclose(out, ref, atol=2e-5, rtol=2e-5), "PALayer f32 mismatch"

    # 2) Masked lane-edge path: HW=400 with a forced 128-lane tile (no padding).
    x_odd = jax.random.normal(ks[0], (N, C, 20, 20), dtype=jnp.float32)
    out_odd = jax.block_until_ready(
        palayer_forward(x_odd, pa_w1, pa_b1, pa_w2, pa_b2,
                        target_tile_bytes=128 * C * 4))
    ref_odd = _palayer_reference(x_odd, pa_w1, pa_b1, pa_w2, pa_b2)
    assert jnp.allclose(out_odd, ref_odd, atol=2e-5, rtol=2e-5), "edge mismatch"

    # 3) Native bf16 I/O path (halves HBM traffic; bf16 MXU on v6e/v7x).
    x_bf = x.astype(jnp.bfloat16)
    out_bf = jax.block_until_ready(palayer_forward(x_bf, pa_w1, pa_b1, pa_w2, pa_b2))
    ref_bf = _palayer_reference(x_bf.astype(jnp.float32), pa_w1, pa_b1, pa_w2, pa_b2)
    assert out_bf.dtype == jnp.bfloat16
    assert jnp.allclose(out_bf.astype(jnp.float32), ref_bf, atol=0.1, rtol=0.1), \
        "PALayer bf16 mismatch"

    # 4) Fused DehazeBlock tail: CALayer scale + PALayer + residual add.
    out_tail = jax.block_until_ready(
        dehazeblock_tail_forward(x, skip, ca_w1, ca_b1, ca_w2, ca_b2,
                                 pa_w1, pa_b1, pa_w2, pa_b2))
    ref_tail = _dehazeblock_tail_reference(x, skip, ca_w1, ca_b1, ca_w2, ca_b2,
                                           pa_w1, pa_b1, pa_w2, pa_b2)
    assert jnp.allclose(out_tail, ref_tail, atol=1e-4, rtol=1e-4), "tail mismatch"

    print("KERNEL_OK")
</pallas_src>

<mosaic_0001>
module attributes {stable_mosaic.version = 11 : i64} {
  func.func @_pa_attention_kernel(%arg0: i32, %arg1: i32, %arg2: memref<1x32x256xf32, #tpu.memory_space<vmem>>, %arg3: memref<4x32xf32, #tpu.memory_space<vmem>>, %arg4: memref<4x1xf32, #tpu.memory_space<vmem>>, %arg5: memref<4x1xf32, #tpu.memory_space<vmem>>, %arg6: memref<1x1xf32, #tpu.memory_space<smem>>, %arg7: memref<1x32x256xf32, #tpu.memory_space<vmem>>) attributes {dimension_semantics = [#tpu.dimension_semantics<parallel>, #tpu.dimension_semantics<parallel>], iteration_bounds = array<i64: 2, 1>, scalar_prefetch = 0 : i64, scratch_operands = 0 : i64, tpu.core_type = #tpu.core_type<tc>, window_params = [{transform_indices = @transform_0, window_bounds = array<i64: 1, 32, 256>}, {pipeline_mode = #tpu.pipeline_mode<synchronous>, transform_indices = @transform_1, window_bounds = array<i64: 4, 32>}, {pipeline_mode = #tpu.pipeline_mode<synchronous>, transform_indices = @transform_2, window_bounds = array<i64: 4, 1>}, {pipeline_mode = #tpu.pipeline_mode<synchronous>, transform_indices = @transform_3, window_bounds = array<i64: 4, 1>}, {transform_indices = @transform_4, window_bounds = array<i64: 1, 1>}, {transform_indices = @transform_5, window_bounds = array<i64: 1, 32, 256>}]} {
    %c0 = arith.constant 0 : index
    %c0_0 = arith.constant 0 : index
    %0 = vector.load %arg3[%c0, %c0_0] : memref<4x32xf32, #tpu.memory_space<vmem>>, vector<4x32xf32>
    %c0_1 = arith.constant 0 : index
    %c0_2 = arith.constant 0 : index
    %1 = vector.load %arg4[%c0_1, %c0_2] : memref<4x1xf32, #tpu.memory_space<vmem>>, vector<4x1xf32>
    %c0_3 = arith.constant 0 : index
    %c0_4 = arith.constant 0 : index
    %2 = vector.load %arg5[%c0_3, %c0_4] : memref<4x1xf32, #tpu.memory_space<vmem>>, vector<4x1xf32>
    %c0_5 = arith.constant 0 : index
    %c0_6 = arith.constant 0 : index
    %3 = memref.load %arg6[%c0_5, %c0_6] : memref<1x1xf32, #tpu.memory_space<smem>>
    %c0_7 = arith.constant 0 : index
    %c0_8 = arith.constant 0 : index
    %c0_9 = arith.constant 0 : index
    %4 = vector.load %arg2[%c0_7, %c0_8, %c0_9] : memref<1x32x256xf32, #tpu.memory_space<vmem>>, vector<1x32x256xf32>
    %5 = vector.shape_cast %4 : vector<1x32x256xf32> to vector<32x256xf32>
    %cst = arith.constant dense<0.000000e+00> : vector<4x256xf32>
    %6 = tpu.matmul %0, %5, %cst {dimension_numbers = #tpu.dot_dimension_numbers<[1], [0], [0], [1], [0, 0, 1, 1], [], []>} : vector<4x32xf32>, vector<32x256xf32>, vector<4x256xf32> -> vector<4x256xf32>
    %7 = vector.broadcast %1 : vector<4x1xf32> to vector<4x256xf32>
    %8 = arith.addf %6, %7 : vector<4x256xf32>
    %cst_10 = arith.constant 0.000000e+00 : f32
    %9 = vector.broadcast %cst_10 : f32 to vector<4x256xf32>
    %10 = arith.maximumf %8, %9 : vector<4x256xf32>
    %11 = vector.broadcast %2 : vector<4x1xf32> to vector<4x256xf32>
    %12 = arith.mulf %10, %11 : vector<4x256xf32>
    %cst_11 = arith.constant dense<0.000000e+00> : vector<256xf32>
    %13 = vector.multi_reduction <add>, %12, %cst_11 [0] : vector<4x256xf32> to vector<256xf32>
    %14 = vector.shape_cast %13 : vector<256xf32> to vector<1x256xf32>
    %15 = vector.broadcast %3 : f32 to vector<1x256xf32>
    %16 = arith.addf %14, %15 : vector<1x256xf32>
    %17 = arith.negf %16 : vector<1x256xf32>
    %18 = math.exp %17 : vector<1x256xf32>
    %cst_12 = arith.constant 1.000000e+00 : f32
    %19 = vector.broadcast %cst_12 : f32 to vector<1x256xf32>
    %20 = arith.addf %19, %18 : vector<1x256xf32>
    %21 = arith.divf %19, %20 : vector<1x256xf32>
    %22 = vector.broadcast %21 : vector<1x256xf32> to vector<32x256xf32>
    %23 = arith.mulf %5, %22 : vector<32x256xf32>
    %c0_13 = arith.constant 0 : index
    %c0_14 = arith.constant 0 : index
    %c0_15 = arith.constant 0 : index
    %24 = vector.load %arg7[%c0_13, %c0_14, %c0_15] : memref<1x32x256xf32, #tpu.memory_space<vmem>>, vector<1x32x256xf32>
    %25 = vector.shape_cast %24 : vector<1x32x256xf32> to vector<32x256xf32>
    %26 = vector.shape_cast %23 : vector<32x256xf32> to vector<1x32x256xf32>
    tpu.vector_store %arg7[%c0_13, %c0_14, %c0_15], %26 {strides = array<i32>} : memref<1x32x256xf32, #tpu.memory_space<vmem>>, vector<1x32x256xf32>,
    return
  }
  func.func @transform_0(%arg0: i32, %arg1: i32) -> (i32, i32, i32) {
    %c0_i32 = arith.constant 0 : i32
    %c0_i32_0 = arith.constant 0 : i32
    return %arg0, %c0_i32, %arg1 : i32, i32, i32
  }
  func.func @transform_1(%arg0: i32, %arg1: i32) -> (i32, i32) {
    %c0_i32 = arith.constant 0 : i32
    %c0_i32_0 = arith.constant 0 : i32
    %c0_i32_1 = arith.constant 0 : i32
    return %c0_i32, %c0_i32_0 : i32, i32
  }
  func.func @transform_2(%arg0: i32, %arg1: i32) -> (i32, i32) {
    %c0_i32 = arith.constant 0 : i32
    %c0_i32_0 = arith.constant 0 : i32
    %c0_i32_1 = arith.constant 0 : i32
    return %c0_i32, %c0_i32_0 : i32, i32
  }
  func.func @transform_3(%arg0: i32, %arg1: i32) -> (i32, i32) {
    %c0_i32 = arith.constant 0 : i32
    %c0_i32_0 = arith.constant 0 : i32
    %c0_i32_1 = arith.constant 0 : i32
    return %c0_i32, %c0_i32_0 : i32, i32
  }
  func.func @transform_4(%arg0: i32, %arg1: i32) -> (i32, i32) {
    %c0_i32 = arith.constant 0 : i32
    %c0_i32_0 = arith.constant 0 : i32
    %c0_i32_1 = arith.constant 0 : i32
    return %c0_i32, %c0_i32_0 : i32, i32
  }
  func.func @transform_5(%arg0: i32, %arg1: i32) -> (i32, i32, i32) {
    %c0_i32 = arith.constant 0 : i32
    %c0_i32_0 = arith.constant 0 : i32
    return %arg0, %c0_i32, %arg1 : i32, i32, i32
  }
}

</mosaic_0001>

<bundles_post_ra>
// kernel: palayer_forward.1
= control target key start
LH: loop header
LB: loop body
LE: loop exit
PB: predicated region body
PF: predicated region fallthrough
CT: control target
= control target key end

     0   :  { %s617_s20 = smov 0   ;;  %s619_s21 = smov 0   ;;  %s674_s0 = inlined_call_operand.vmem [shape: f32[2,32,256], index: 0, kind: input, shape index: {}]   ;;  %s675_s1 = inlined_call_operand.vmem [shape: f32[4,32], index: 1, kind: input, shape index: {}]   ;;  %s676_s2 = inlined_call_operand.vmem [shape: f32[4,1], index: 2, kind: input, shape index: {}]   ;;  %s677_s3 = inlined_call_operand.vmem [shape: f32[4,1], index: 3, kind: input, shape index: {}]   ;;  %s678_s4 = inlined_call_operand.<no memory space> [shape: f32[1,1], index: 4, kind: input, shape index: {}]   ;;  %s679_s5 = inlined_call_operand.vmem [shape: f32[2,32,256], index: 5, kind: output, shape index: {}]  }
   0x1   :  { %10 = sst [smem:[#allocation2]] %s678_s4  ;;  %s621_s22 = smov 0  }
   0x2 LB: > { %s28_s4 = sadd.s32 1, %s576_s21  ;;  %p503_p0 = scmp.ge.s32.totalorder %s580_s22, 1  ;;  %s580_s22 = sphi %s621_s22, %s16_s22   ;;  %s576_s21 = sphi %s619_s21, %s681_s21   ;;  %s572_s20 = sphi %s617_s20, %s680_s20  }
   0x3   : > { %p30_p1 = scmp.ge.s32.totalorder %s28_s4, 2  ;;  %p209_p2 = scmp.lt.s32.totalorder %s580_s22, 3 }
   0x5   : > { %s683_s4 = smov (%p30_p1, %s28_s4), 0  ;;  %p210_p3 = pnand %p503_p0, %p209_p2 }
   0x6   : > { %p246_p4 = scmp.lt.s32.totalorder (!%p210_p3), %s572_s20, 1  ;;  %v582_v0 = vmov (!%p210_p3), 0.0   ;;  %v583_v1 = vmov (!%p210_p3), 0   ;;  %v266_v2 = vld [vmem:[%s676_s2] sm:$0xf] (!%p210_p3)  ;;  %vm282_vm0 = vcmask (!%p210_p3), 261120  }
   0x7   : > { %213 = sbr.rel (%p210_p3) target bundleno = 293 (0x125), region = 40  ;;  %350 = vmatprep.mubr.f32.mxu0 (!%p210_p3), %v582_v0  ;;  %549 = vset.pattern.permute.xlu0 (!%p210_p3), %v583_v1  ;;  %v267_v3 = vld [vmem:[%s677_s3] sm:$0xf] (!%p210_p3)  ;;  %vm366_vm1 = vcmask (!%p210_p3), 1043456   ;;  %s268_s8 = sld [smem:[#allocation2]] (!%p210_p3) }
   0x8   : > { %279 = vperm.xlu0 (!%p210_p3), %549, %v266_v2   ;;  %v265_v16 = vld [vmem:[%s675_s1] sm:$0xf] (!%p210_p3) }
   0xc   : > { %361 = vperm.xlu0 (!%p210_p3), %549, %v267_v3  }
   0xd   : > { %v381_v38 = vstv (!%p210_p3), %s268_s8 }
   0xe   : > { %s685_s20 = smov (!%p246_p4, %s572_s20), 1 }
   0xf   : > { %s513_s27 = sshll.u32 %s685_s20, 6 }
  0x10   : > { %s253_s30 = scalar_lea.vmem %s674_s0, %s513_s27  ;;  %s263_s11 = scalar_lea.vmem %s679_s5, %s513_s27 }
  0x11   : > { %v649_v4 = vld [vmem:[%s253_s30 + $0x8] sm:$0xff]  ;;  %v651_v5 = vld [vmem:[%s253_s30 + $0x18] sm:$0xff]  ;;  %v269_v6 = vld [vmem:[%s253_s30] sm:$0xff] }
  0x12   : > { %v515_v7 = vpack.c.bf16 %v651_v5, %v649_v4  ;;  %v271_v8 = vld [vmem:[%s253_s30 + $0x10] sm:$0xff]  ;;  %v274_v9 = vld [vmem:[%s253_s30 + $0x28] sm:$0xff]  ;;  %v276_v10 = vld [vmem:[%s253_s30 + $0x38] sm:$0xff] }
  0x13   : > { %v517_v11 = vpack.c.bf16 %v271_v8, %v269_v6  ;;  %v519_v12 = vpack.c.bf16 %v276_v10, %v274_v9  ;;  %v273_v13 = vld [vmem:[%s253_s30 + $0x20] sm:$0xff]  ;;  %v275_v14 = vld [vmem:[%s253_s30 + $0x30] sm:$0xff] }
  0x14   : > { %516 = vmatprep.subr.bf16.mxu0 %v515_v7  ;;  %v521_v15 = vpack.c.bf16 %v275_v14, %v273_v13 }
  0x15   : > { %518 = vmatpush1.bf16.msra.mxu0 %v517_v11 }
  0x16   : > { %520 = vmatprep.subr.bf16.mxu0 %v519_v12 }
  0x19   : > { %522 = vmatpush1.bf16.msra.mxu0 %v521_v15 }
  0x1c   : > { %508 = vmatmul.mubr.msk.f32.vlgmr.msra.gmra.mrb[0].mxu0 %vm282_vm0, %v265_v16 }
  0x87   : > { %v280_v17 = vpop.permute.xlu0 %279 }
  0x8b   : > { %v362_v23 = vpop.permute.xlu0 %361 }
  0xef   : > { %v352_v18 = vpop.f32.mrb[0].mxu0 }
  0xf0   : > { %v353_v19 = vadd.f32 %v352_v18, %v280_v17  ;;  %v354_v20 = vpop.f32.mrb[1].mxu0 }
  0xf1   : > { %v355_v21 = vadd.f32 %v354_v20, %v280_v17 }
  0xf2   : > { %v357_v22 = vmax.f32 %v353_v19, 0.0 }
  0xf3   : > { %v358_v24 = vmax.f32 %v355_v21, 0.0 }
  0xf4   : > { %v364_v25 = vmul.f32 %v362_v23, %v357_v22 }
  0xf5   : > { %v365_v26 = vmul.f32 %v362_v23, %v358_v24 }
  0xf6   : > { %v367_v27 = vsel %vm366_vm1, %v364_v25, 0.0 }
  0xf7   : > { %v368_v28 = vrot.slane %v367_v27, 4  ;;  %v374_v29 = vsel %vm366_vm1, %v365_v26, 0.0 }
  0xf8   : > { %v375_v30 = vrot.slane %v374_v29, 4 }
  0xf9   : > { %v369_v31 = vadd.f32 %v368_v28, %v367_v27 }
  0xfa   : > { %v376_v32 = vadd.f32 %v375_v30, %v374_v29 }
  0xfb   : > { %v370_v33 = vrot.slane %v369_v31, 2 }
  0xfc   : > { %v377_v34 = vrot.slane %v376_v32, 2 }
  0xfd   : > { %v371_v35 = vadd.f32 %v370_v33, %v369_v31 }
  0xfe   : > { %v378_v36 = vadd.f32 %v377_v34, %v376_v32 }
  0xff   : > { %v372_v37 = vrot.slane %v371_v35, 1 }
 0x100   : > { %v379_v39 = vrot.slane %v378_v36, 1 }
 0x101   : > { %v373_v40 = vadd.f32 %v372_v37, %v371_v35 }
 0x102   : > { %v380_v41 = vadd.f32 %v379_v39, %v378_v36 }
 0x103   : > { %v382_v42 = vadd.f32 %v381_v38, %v373_v40 }
 0x104   : > { %v383_v43 = vadd.f32 %v381_v38, %v380_v41 }
 0x105   : > { %v509_v44 = vmul.f32 -1.442695, %v382_v42 }
 0x106   : > { %v510_v45 = vmul.f32 -1.442695, %v383_v43 }
 0x107   : > { %550 = vpow2.f32 %v509_v44 }
 0x108   : > { %552 = vpow2.f32 %v510_v45 }
 0x111   : > { %v551_v46 = vpop.eup %550 }
 0x112   : > { %v553_v47 = vpop.eup %552  ;;  %v390_v48 = vadd.f32 1.0, %v551_v46 }
 0x113   : > { %v391_v49 = vadd.f32 1.0, %v553_v47 }
 0x114   : > { %554 = vrcp.f32 %v390_v48 }
 0x115   : > { %556 = vrcp.f32 %v391_v49 }
 0x11e   : > { %v555_v50 = vpop.eup %554 }
 0x11f   : > { %v557_v51 = vpop.eup %556  ;;  %v396_v52 = vmul.f32 %v555_v50, %v269_v6  ;;  %v398_v53 = vmul.f32 %v555_v50, %v271_v8  ;;  %v400_v54 = vmul.f32 %v555_v50, %v273_v13  ;;  %v402_v55 = vmul.f32 %v555_v50, %v275_v14 }
 0x120   : > { %v397_v56 = vmul.f32 %v557_v51, %v649_v4  ;;  %v399_v57 = vmul.f32 %v557_v51, %v651_v5  ;;  %v401_v58 = vmul.f32 %v557_v51, %v274_v9  ;;  %v403_v59 = vmul.f32 %v557_v51, %v276_v10 }
 0x121   : > { %404 = vst [vmem:[%s263_s11] sm:$0xff] %v396_v52  ;;  %406 = vst [vmem:[%s263_s11 + $0x10] sm:$0xff] %v398_v53 }
 0x122   : > { %408 = vst [vmem:[%s263_s11 + $0x20] sm:$0xff] %v400_v54  ;;  %410 = vst [vmem:[%s263_s11 + $0x30] sm:$0xff] %v402_v55 }
 0x123   : > { %405 = vst [vmem:[%s263_s11 + $0x8] sm:$0xff] %v397_v56  ;;  %407 = vst [vmem:[%s263_s11 + $0x18] sm:$0xff] %v399_v57 }
 0x124   : > { %409 = vst [vmem:[%s263_s11 + $0x28] sm:$0xff] %v401_v58  ;;  %411 = vst [vmem:[%s263_s11 + $0x38] sm:$0xff] %v403_v59 }
 0x125 PF: > { %s16_s22 = sadd.s32 1, %s580_s22   ;;  %s680_s20 = smov %s576_s21 }
 0x126   : > { %p13_p5 = scmp.ge.s32.totalorder %s16_s22, 4   ;;  %s681_s21 = smov %s683_s4 }
 0x128   :  { %15 = sbr.rel (!%p13_p5) target bundleno = 2 (0x2), region = 70 }

</bundles_post_ra>
